<compile_context>
chip_gen: v7x
topology: tpu7x:2x2x1
jax: 0.10.0
libtpu: 0.0.40
codegen_flags: <defaults>
</compile_context>

<pallas_src>
import math

import jax
import jax.numpy as jnp
from jax.experimental import pallas as pl
from jax.experimental.pallas import tpu as pltpu

LANES = 128


def _hpf_kernel(xs_ref, w_ref, o_ref):
    """Single-step packed depthwise 3x3 conv.

    xs_ref: (3, H+2, Lpad)  lane-pre-shifted packed inputs;
                            xs[dx][r, q] == x_packed[r, q + dx - 1]
    w_ref:  (9, H, Lpad)    per-lane filter tap k = dy*3 + dx, pre-broadcast
                            over the H output rows
    o_ref:  (H, Lpad)       packed output rows
    """
    th = o_ref.shape[0]

    # Initialize the accumulator from the (dy=0, dx=1) unshifted tap — avoids
    # materializing a zeros vreg block and one extra vadd per output vreg.
    acc = w_ref[1] * xs_ref[1, 0:th, :]
    for dy in range(3):
        for dx in range(3):
            if dy == 0 and dx == 1:
                continue
            k = dy * 3 + dx
            acc = acc + w_ref[k] * xs_ref[dx, dy:dy + th, :]
    o_ref[...] = acc.astype(o_ref.dtype)


@jax.jit
def hpf_forward(x, weight):
    """Depthwise 3x3 conv, padding=1, groups=C, no bias (NCHW x, OIHW weight)."""
    N, C, H, W = x.shape
    Wp = W + 2
    P = N * C                         # number of (batch, channel) planes
    L = P * Wp                        # valid packed lane width
    Lpad = -(-L // LANES) * LANES     # pad lanes up to a multiple of 128

    # ---- layout plumbing (fused under jit; presents a lane-dense slab) ----
    # zero-pad H/W by 1 and pack planes side-by-side along lanes:
    #   lane (p*Wp + u) of row r == x_pad[n, c, r, u]   with p = n*C + c
    x_pad = jnp.pad(x, ((0, 0), (0, 0), (1, 1), (1, 1)))               # (N,C,H+2,Wp)
    xp = jnp.transpose(x_pad, (2, 0, 1, 3)).reshape(H + 2, L)          # (H+2, L)
    xp = jnp.pad(xp, ((0, 0), (0, Lpad - L)))                          # (H+2, Lpad)

    # Lane-pre-shifted slabs (built once here, not in the kernel):
    #   xs[dx][r, q] == xp[r, q + dx - 1]
    # Per-plane zero pad columns keep plane boundaries clean; the only lanes
    # that see the slab edge fill are discarded by the unpack below.
    x_m1 = jnp.pad(xp, ((0, 0), (1, 0)))[:, :Lpad]    # dx = 0 -> column q-1
    x_p1 = jnp.pad(xp, ((0, 0), (0, 1)))[:, 1:]       # dx = 2 -> column q+1
    xs = jnp.stack([x_m1, xp, x_p1], axis=0)          # (3, H+2, Lpad)

    # Per-lane filter taps: row k = dy*3+dx; lanes of plane p = n*C + c carry
    # weight[c].  Pre-broadcast over the H output rows so the kernel has no
    # per-tap broadcast_in_dim.
    w_planes = jnp.tile(weight[:, 0, :, :], (N, 1, 1))                 # (P, 3, 3)
    w_lanes = jnp.repeat(w_planes, Wp, axis=0).reshape(L, 9).T         # (9, L)
    w_lanes = jnp.pad(w_lanes, ((0, 0), (0, Lpad - L))).astype(jnp.float32)
    w_full = jnp.broadcast_to(w_lanes[:, None, :], (9, H, Lpad))       # (9, H, Lpad)

    # Single grid step: full-extent blocks (~100 KiB total working set, far
    # under VMEM on every generation); per-step overhead paid exactly once.
    out_packed = pl.pallas_call(
        _hpf_kernel,
        out_shape=jax.ShapeDtypeStruct((H, Lpad), x.dtype),
        grid=(1,),
        in_specs=[
            pl.BlockSpec((3, H + 2, Lpad), lambda i: (0, 0, 0)),
            pl.BlockSpec((9, H, Lpad), lambda i: (0, 0, 0)),
        ],
        out_specs=pl.BlockSpec((H, Lpad), lambda i: (0, 0)),
        compiler_params=pltpu.CompilerParams(
            dimension_semantics=("arbitrary",),
        ),
    )(xs, w_full)

    # unpack: drop pad lanes, drop per-plane border columns, back to NCHW
    out = out_packed[:, :L].reshape(H, N, C, Wp)[:, :, :, 1:W + 1]
    return jnp.transpose(out, (1, 2, 0, 3))                            # (N, C, H, W)


def _reference_conv(x, weight):
    # Pure-JAX reference: grouped (depthwise) conv.
    C = x.shape[1]
    return jax.lax.conv_general_dilated(
        x, weight,
        window_strides=(1, 1),
        padding=((1, 1), (1, 1)),
        dimension_numbers=("NCHW", "OIHW", "NCHW"),
        feature_group_count=C,
    )


if __name__ == "__main__":
    key = jax.random.PRNGKey(0)
    k_x, k_w = jax.random.split(key)

    N, C, H, W = 2, 3, 16, 16  # module fixes C=3 (Conv2d(3, 3, groups=3))
    x = jax.random.normal(k_x, (N, C, H, W), dtype=jnp.float32)

    # kaiming_normal_(mode='fan_out', nonlinearity='relu'):
    # fan_out = out_channels/groups? -> PyTorch uses out_channels*kh*kw = 27
    fan_out = C * 3 * 3
    std = math.sqrt(2.0 / fan_out)
    weight = std * jax.random.normal(k_w, (C, 1, 3, 3), dtype=jnp.float32)

    out = jax.block_until_ready(hpf_forward(x, weight))

    ref = _reference_conv(x, weight)
    assert out.shape == (N, C, H, W)
    assert jnp.allclose(out, ref, atol=1e-5, rtol=1e-5), "mismatch vs reference conv"

    print("KERNEL_OK")
</pallas_src>

<mosaic_0001>
module attributes {stable_mosaic.version = 11 : i64} {
  func.func @_hpf_kernel(%arg0: i32, %arg1: memref<3x18x128xf32, #tpu.memory_space<vmem>>, %arg2: memref<9x16x128xf32, #tpu.memory_space<vmem>>, %arg3: memref<16x128xf32, #tpu.memory_space<vmem>>) attributes {dimension_semantics = [#tpu.dimension_semantics<arbitrary>], iteration_bounds = array<i64: 1>, scalar_prefetch = 0 : i64, scratch_operands = 0 : i64, tpu.core_type = #tpu.core_type<tc>, window_params = [{pipeline_mode = #tpu.pipeline_mode<synchronous>, transform_indices = @transform_0, window_bounds = array<i64: 3, 18, 128>}, {pipeline_mode = #tpu.pipeline_mode<synchronous>, transform_indices = @transform_1, window_bounds = array<i64: 9, 16, 128>}, {pipeline_mode = #tpu.pipeline_mode<synchronous>, transform_indices = @transform_2, window_bounds = array<i64: 16, 128>}]} {
    %c1 = arith.constant 1 : index
    %c0 = arith.constant 0 : index
    %c0_0 = arith.constant 0 : index
    %0 = vector.load %arg2[%c1, %c0, %c0_0] : memref<9x16x128xf32, #tpu.memory_space<vmem>>, vector<1x16x128xf32>
    %1 = vector.shape_cast %0 : vector<1x16x128xf32> to vector<16x128xf32>
    %c1_1 = arith.constant 1 : index
    %c0_2 = arith.constant 0 : index
    %c0_3 = arith.constant 0 : index
    %2 = vector.load %arg1[%c1_1, %c0_2, %c0_3] : memref<3x18x128xf32, #tpu.memory_space<vmem>>, vector<1x16x128xf32>
    %3 = vector.shape_cast %2 : vector<1x16x128xf32> to vector<16x128xf32>
    %4 = arith.mulf %1, %3 : vector<16x128xf32>
    %c0_4 = arith.constant 0 : index
    %c0_5 = arith.constant 0 : index
    %c0_6 = arith.constant 0 : index
    %5 = vector.load %arg2[%c0_4, %c0_5, %c0_6] : memref<9x16x128xf32, #tpu.memory_space<vmem>>, vector<1x16x128xf32>
    %6 = vector.shape_cast %5 : vector<1x16x128xf32> to vector<16x128xf32>
    %c0_7 = arith.constant 0 : index
    %c0_8 = arith.constant 0 : index
    %c0_9 = arith.constant 0 : index
    %7 = vector.load %arg1[%c0_7, %c0_8, %c0_9] : memref<3x18x128xf32, #tpu.memory_space<vmem>>, vector<1x16x128xf32>
    %8 = vector.shape_cast %7 : vector<1x16x128xf32> to vector<16x128xf32>
    %9 = arith.mulf %6, %8 : vector<16x128xf32>
    %10 = arith.addf %4, %9 : vector<16x128xf32>
    %c2 = arith.constant 2 : index
    %c0_10 = arith.constant 0 : index
    %c0_11 = arith.constant 0 : index
    %11 = vector.load %arg2[%c2, %c0_10, %c0_11] : memref<9x16x128xf32, #tpu.memory_space<vmem>>, vector<1x16x128xf32>
    %12 = vector.shape_cast %11 : vector<1x16x128xf32> to vector<16x128xf32>
    %c2_12 = arith.constant 2 : index
    %c0_13 = arith.constant 0 : index
    %c0_14 = arith.constant 0 : index
    %13 = vector.load %arg1[%c2_12, %c0_13, %c0_14] : memref<3x18x128xf32, #tpu.memory_space<vmem>>, vector<1x16x128xf32>
    %14 = vector.shape_cast %13 : vector<1x16x128xf32> to vector<16x128xf32>
    %15 = arith.mulf %12, %14 : vector<16x128xf32>
    %16 = arith.addf %10, %15 : vector<16x128xf32>
    %c3 = arith.constant 3 : index
    %c0_15 = arith.constant 0 : index
    %c0_16 = arith.constant 0 : index
    %17 = vector.load %arg2[%c3, %c0_15, %c0_16] : memref<9x16x128xf32, #tpu.memory_space<vmem>>, vector<1x16x128xf32>
    %18 = vector.shape_cast %17 : vector<1x16x128xf32> to vector<16x128xf32>
    %c0_17 = arith.constant 0 : index
    %c1_18 = arith.constant 1 : index
    %c0_19 = arith.constant 0 : index
    %19 = vector.load %arg1[%c0_17, %c1_18, %c0_19] : memref<3x18x128xf32, #tpu.memory_space<vmem>>, vector<1x16x128xf32>
    %20 = vector.shape_cast %19 : vector<1x16x128xf32> to vector<16x128xf32>
    %21 = arith.mulf %18, %20 : vector<16x128xf32>
    %22 = arith.addf %16, %21 : vector<16x128xf32>
    %c4 = arith.constant 4 : index
    %c0_20 = arith.constant 0 : index
    %c0_21 = arith.constant 0 : index
    %23 = vector.load %arg2[%c4, %c0_20, %c0_21] : memref<9x16x128xf32, #tpu.memory_space<vmem>>, vector<1x16x128xf32>
    %24 = vector.shape_cast %23 : vector<1x16x128xf32> to vector<16x128xf32>
    %c1_22 = arith.constant 1 : index
    %c1_23 = arith.constant 1 : index
    %c0_24 = arith.constant 0 : index
    %25 = vector.load %arg1[%c1_22, %c1_23, %c0_24] : memref<3x18x128xf32, #tpu.memory_space<vmem>>, vector<1x16x128xf32>
    %26 = vector.shape_cast %25 : vector<1x16x128xf32> to vector<16x128xf32>
    %27 = arith.mulf %24, %26 : vector<16x128xf32>
    %28 = arith.addf %22, %27 : vector<16x128xf32>
    %c5 = arith.constant 5 : index
    %c0_25 = arith.constant 0 : index
    %c0_26 = arith.constant 0 : index
    %29 = vector.load %arg2[%c5, %c0_25, %c0_26] : memref<9x16x128xf32, #tpu.memory_space<vmem>>, vector<1x16x128xf32>
    %30 = vector.shape_cast %29 : vector<1x16x128xf32> to vector<16x128xf32>
    %c2_27 = arith.constant 2 : index
    %c1_28 = arith.constant 1 : index
    %c0_29 = arith.constant 0 : index
    %31 = vector.load %arg1[%c2_27, %c1_28, %c0_29] : memref<3x18x128xf32, #tpu.memory_space<vmem>>, vector<1x16x128xf32>
    %32 = vector.shape_cast %31 : vector<1x16x128xf32> to vector<16x128xf32>
    %33 = arith.mulf %30, %32 : vector<16x128xf32>
    %34 = arith.addf %28, %33 : vector<16x128xf32>
    %c6 = arith.constant 6 : index
    %c0_30 = arith.constant 0 : index
    %c0_31 = arith.constant 0 : index
    %35 = vector.load %arg2[%c6, %c0_30, %c0_31] : memref<9x16x128xf32, #tpu.memory_space<vmem>>, vector<1x16x128xf32>
    %36 = vector.shape_cast %35 : vector<1x16x128xf32> to vector<16x128xf32>
    %c0_32 = arith.constant 0 : index
    %c2_33 = arith.constant 2 : index
    %c0_34 = arith.constant 0 : index
    %37 = vector.load %arg1[%c0_32, %c2_33, %c0_34] : memref<3x18x128xf32, #tpu.memory_space<vmem>>, vector<1x16x128xf32>
    %38 = vector.shape_cast %37 : vector<1x16x128xf32> to vector<16x128xf32>
    %39 = arith.mulf %36, %38 : vector<16x128xf32>
    %40 = arith.addf %34, %39 : vector<16x128xf32>
    %c7 = arith.constant 7 : index
    %c0_35 = arith.constant 0 : index
    %c0_36 = arith.constant 0 : index
    %41 = vector.load %arg2[%c7, %c0_35, %c0_36] : memref<9x16x128xf32, #tpu.memory_space<vmem>>, vector<1x16x128xf32>
    %42 = vector.shape_cast %41 : vector<1x16x128xf32> to vector<16x128xf32>
    %c1_37 = arith.constant 1 : index
    %c2_38 = arith.constant 2 : index
    %c0_39 = arith.constant 0 : index
    %43 = vector.load %arg1[%c1_37, %c2_38, %c0_39] : memref<3x18x128xf32, #tpu.memory_space<vmem>>, vector<1x16x128xf32>
    %44 = vector.shape_cast %43 : vector<1x16x128xf32> to vector<16x128xf32>
    %45 = arith.mulf %42, %44 : vector<16x128xf32>
    %46 = arith.addf %40, %45 : vector<16x128xf32>
    %c8 = arith.constant 8 : index
    %c0_40 = arith.constant 0 : index
    %c0_41 = arith.constant 0 : index
    %47 = vector.load %arg2[%c8, %c0_40, %c0_41] : memref<9x16x128xf32, #tpu.memory_space<vmem>>, vector<1x16x128xf32>
    %48 = vector.shape_cast %47 : vector<1x16x128xf32> to vector<16x128xf32>
    %c2_42 = arith.constant 2 : index
    %c2_43 = arith.constant 2 : index
    %c0_44 = arith.constant 0 : index
    %49 = vector.load %arg1[%c2_42, %c2_43, %c0_44] : memref<3x18x128xf32, #tpu.memory_space<vmem>>, vector<1x16x128xf32>
    %50 = vector.shape_cast %49 : vector<1x16x128xf32> to vector<16x128xf32>
    %51 = arith.mulf %48, %50 : vector<16x128xf32>
    %52 = arith.addf %46, %51 : vector<16x128xf32>
    %c0_45 = arith.constant 0 : index
    %c0_46 = arith.constant 0 : index
    %53 = vector.load %arg3[%c0_45, %c0_46] : memref<16x128xf32, #tpu.memory_space<vmem>>, vector<16x128xf32>
    tpu.vector_store %arg3[%c0_45, %c0_46], %52 {strides = array<i32>} : memref<16x128xf32, #tpu.memory_space<vmem>>, vector<16x128xf32>,
    return
  }
  func.func @transform_0(%arg0: i32) -> (i32, i32, i32) {
    %c0_i32 = arith.constant 0 : i32
    %c0_i32_0 = arith.constant 0 : i32
    %c0_i32_1 = arith.constant 0 : i32
    %c0_i32_2 = arith.constant 0 : i32
    return %c0_i32, %c0_i32_0, %c0_i32_1 : i32, i32, i32
  }
  func.func @transform_1(%arg0: i32) -> (i32, i32, i32) {
    %c0_i32 = arith.constant 0 : i32
    %c0_i32_0 = arith.constant 0 : i32
    %c0_i32_1 = arith.constant 0 : i32
    %c0_i32_2 = arith.constant 0 : i32
    return %c0_i32, %c0_i32_0, %c0_i32_1 : i32, i32, i32
  }
  func.func @transform_2(%arg0: i32) -> (i32, i32) {
    %c0_i32 = arith.constant 0 : i32
    %c0_i32_0 = arith.constant 0 : i32
    %c0_i32_1 = arith.constant 0 : i32
    return %c0_i32, %c0_i32_0 : i32, i32
  }
}

</mosaic_0001>

<bundles_post_ra>
// kernel: tile.7
= control target key start
LH: loop header
LB: loop body
LE: loop exit
PB: predicated region body
PF: predicated region fallthrough
CT: control target
= control target key end

     0   :  { %vm47_vm0 = vcmask 1047556   ;;  %vm49_vm1 = vcmask 23552   ;;  %vm68_vm2 = vcmask 48152   ;;  %s164_s0 = inlined_call_operand.vmem [shape: f32[2,3,3,3], index: 0, kind: input, shape index: {}]   ;;  %s165_s1 = inlined_call_operand.vmem [shape: f32[6,3,3], index: 1, kind: output, shape index: {}]  }
   0x1   :  { %v107_v0 = vld [vmem:[%s164_s0 + $0xe] sm:$0x3]  ;;  %v108_v1 = vld [vmem:[%s164_s0 + $0xc] sm:$0x3]  ;;  %v109_v2 = vld [vmem:[%s164_s0 + $0xa] sm:$0x3] }
   0x2   :  { %13 = vst [vmem:[#allocation1 + $0x38] sm:$0x3] %v107_v0  ;;  %18 = vst [vmem:[#allocation1 + $0x30] sm:$0x3] %v108_v1  ;;  %v110_v3 = vld [vmem:[%s164_s0 + $0x8] sm:$0x3] }
   0x3   :  { %23 = vst [vmem:[#allocation1 + $0x28] sm:$0x3] %v109_v2  ;;  %v111_v4 = vld [vmem:[%s164_s0 + $0x6] sm:$0x3]  ;;  %v112_v5 = vld [vmem:[%s164_s0 + $0x4] sm:$0x3] }
   0x4   :  { %28 = vst [vmem:[#allocation1 + $0x20] sm:$0x3] %v110_v3  ;;  %33 = vst [vmem:[#allocation1 + $0x18] sm:$0x3] %v111_v4  ;;  %v113_v6 = vld [vmem:[%s164_s0 + $0x2] sm:$0x3] }
   0x5   :  { %38 = vst [vmem:[#allocation1 + $0x10] sm:$0x3] %v112_v5  ;;  %v43_v7 = vld [vmem:[%s164_s0] sm:$0x3]  ;;  %42 = vst [vmem:[#allocation1 + $0x8] sm:$0x3] %v113_v6 }
   0x6   :  { %44 = vst [vmem:[#allocation1] sm:$0x3] %v43_v7  ;;  %v106_v8 = vld [vmem:[%s164_s0 + $0x10] sm:$0x3]  ;;  %s117_s0 = smov 3  }
   0x7   :  { %8 = vst [vmem:[#allocation1 + $0x40] sm:$0x3] %v106_v8 }
   0xb   :  { %v63_v9 = vld [vmem:[#allocation1 + $0x1] ss:$8 sm:$0xf0]   ;;  %v46_v10 = vld [vmem:[#allocation1] ss:$8 sm:$0xf0]  }
   0xd   :  { %v45_v11 = vld [vmem:[#allocation1] ss:$8 sm:$0xf]   ;;  %v61_v12 = vld [vmem:[#allocation1 + $0x1] ss:$8 sm:$0xf]  }
   0xe   :  { %v65_v13 = vsel %vm47_vm0, %v63_v9, %v61_v12  ;;  %v48_v14 = vsel %vm47_vm0, %v46_v10, %v45_v11  ;;  %v56_v15 = vld [vmem:[#allocation1 + $0x40] sm:$0x1]   ;;  %v75_v16 = vld [vmem:[#allocation1 + $0x41] sm:$0x1]  }
   0xf   :  { %66 = vrot.lane.b32.xlu0 %v65_v13, %s117_s0  ;;  %50 = vst.msk [vmem:[#allocation0] sm:$0x7] %vm49_vm1, %v48_v14   ;;  %52 = vst.msk [vmem:[#allocation0 + $0x5] sm:$0x38] %vm49_vm1, %v48_v14  }
  0x10   :  { %54 = vst.msk [vmem:[#allocation0 + $0xa] sm:$0xc0] %vm49_vm1, %v48_v14   ;;  %59 = vst.msk [vmem:[#allocation0 + $0x12] sm:$0x1] %vm49_vm1, %v56_v15  }
  0x13   :  { %76 = vrot.lane.b32.xlu0 %v75_v16, %s117_s0 }
  0x81   :  { %v67_v17 = vpop.permute.xlu0 %66  }
  0x82   :  { %69 = vst.msk [vmem:[#allocation0] sm:$0x7] %vm68_vm2, %v67_v17   ;;  %71 = vst.msk [vmem:[#allocation0 + $0x5] sm:$0x38] %vm68_vm2, %v67_v17  }
  0x83   :  { %73 = vst.msk [vmem:[#allocation0 + $0xa] sm:$0xc0] %vm68_vm2, %v67_v17  }
  0x85   :  { %v77_v18 = vpop.permute.xlu0 %76  }
  0x86   :  { %80 = vst.msk [vmem:[#allocation0 + $0x12] sm:$0x1] %vm68_vm2, %v77_v18  }
  0x89   :  { %v84_v19 = vld [vmem:[#allocation0] sm:$0xf]  ;;  %v88_v20 = vld [vmem:[#allocation0 + $0x8] sm:$0xf] }
  0x8a   :  { %86 = vst [vmem:[%s165_s1] sm:$0xf] %v84_v19  ;;  %114 = vst [vmem:[%s165_s1 + $0x4] sm:$0xf] %v88_v20 }
  0x8d   :  { %v93_v21 = vld [vmem:[#allocation0 + $0x10] sm:$0xf] }
  0x8e   :  { %115 = vst [vmem:[%s165_s1 + $0x8] sm:$0xf] %v93_v21 }

// kernel: hpf_forward.1
= control target key start
LH: loop header
LB: loop body
LE: loop exit
PB: predicated region body
PF: predicated region fallthrough
CT: control target
= control target key end

     0   :  { %s254_s0 = inlined_call_operand.vmem [shape: f32[3,18,128], index: 0, kind: input, shape index: {}]   ;;  %s255_s1 = inlined_call_operand.vmem [shape: f32[9,16,128], index: 1, kind: input, shape index: {}]   ;;  %s256_s2 = inlined_call_operand.vmem [shape: f32[16,128], index: 2, kind: output, shape index: {}]  }
   0x1   :  { %v97_v0 = vld [vmem:[%s255_s1 + $0x10] sm:$0xff]  ;;  %v99_v1 = vld [vmem:[%s254_s0 + $0x18] sm:$0xff]  ;;  %v19_v2 = vld [vmem:[%s255_s1] sm:$0xff] }
   0x2   :  { %v17_v3 = vmul.f32 %v99_v1, %v97_v0  ;;  %v21_v4 = vld [vmem:[%s254_s0] sm:$0xff]  ;;  %v103_v6 = vld [vmem:[%s254_s0 + $0x30] sm:$0xff]  ;;  %v98_v21 = vld [vmem:[%s255_s1 + $0x18] sm:$0xff] }
   0x3   :  { %v101_v5 = vld [vmem:[%s255_s1 + $0x20] sm:$0xff]  ;;  %v23_v7 = vmul.f32 %v21_v4, %v19_v2  ;;  %v105_v9 = vld [vmem:[%s255_s1 + $0x30] sm:$0xff]  ;;  %v20_v23 = vld [vmem:[%s255_s1 + $0x8] sm:$0xff] }
   0x4   :  { %v33_v8 = vmul.f32 %v103_v6, %v101_v5  ;;  %v40_v10 = vld [vmem:[%s254_s0 + $0x1] sm:$0xff]  ;;  %v109_v12 = vld [vmem:[%s254_s0 + $0x19] sm:$0xff]  ;;  %v111_v15 = vld [vmem:[%s255_s1 + $0x50] sm:$0xff] }
   0x5   :  { %v107_v11 = vld [vmem:[%s255_s1 + $0x40] sm:$0xff]  ;;  %v25_v13 = vadd.f32 %v23_v7, %v17_v3  ;;  %v42_v14 = vmul.f32 %v105_v9, %v40_v10  ;;  %v113_v16 = vld [vmem:[%s254_s0 + $0x31] sm:$0xff]  ;;  %v22_v25 = vld [vmem:[%s254_s0 + $0x8] sm:$0xff] }
   0x6   :  { %v115_v17 = vld [vmem:[%s255_s1 + $0x60] sm:$0xff]  ;;  %v51_v20 = vmul.f32 %v109_v12, %v107_v11  ;;  %v102_v26 = vld [vmem:[%s255_s1 + $0x28] sm:$0xff]  ;;  %v104_v27 = vld [vmem:[%s254_s0 + $0x38] sm:$0xff]  ;;  %v60_v29 = vmul.f32 %v113_v16, %v111_v15  ;;  %v24_v31 = vmul.f32 %v22_v25, %v20_v23 }
   0x7   :  { %v67_v18 = vld [vmem:[%s254_s0 + $0x2] sm:$0xff]  ;;  %v35_v19 = vadd.f32 %v33_v8, %v25_v13  ;;  %v117_v30 = vld [vmem:[%s255_s1 + $0x70] sm:$0xff]  ;;  %v34_v32 = vmul.f32 %v104_v27, %v102_v26  ;;  %v106_v33 = vld [vmem:[%s255_s1 + $0x38] sm:$0xff] }
   0x8   :  { %v100_v22 = vld [vmem:[%s254_s0 + $0x20] sm:$0xff]  ;;  %v41_v34 = vld [vmem:[%s254_s0 + $0x9] sm:$0xff]  ;;  %v69_v39 = vmul.f32 %v115_v17, %v67_v18  ;;  %v123_v43 = vld [vmem:[%s254_s0 + $0x32] sm:$0xff] }
   0x9   :  { %v18_v24 = vmul.f32 %v100_v22, %v98_v21  ;;  %v44_v28 = vadd.f32 %v42_v14, %v35_v19  ;;  %v119_v35 = vld [vmem:[%s254_s0 + $0x1a] sm:$0xff]  ;;  %v108_v36 = vld [vmem:[%s255_s1 + $0x48] sm:$0xff]  ;;  %v43_v42 = vmul.f32 %v106_v33, %v41_v34 }
   0xa   :  { %v110_v37 = vld [vmem:[%s254_s0 + $0x21] sm:$0xff]  ;;  %v112_v44 = vld [vmem:[%s255_s1 + $0x58] sm:$0xff]  ;;  %v78_v47 = vmul.f32 %v119_v35, %v117_v30  ;;  %v68_v51 = vld [vmem:[%s254_s0 + $0xa] sm:$0xff] }
   0xb   :  { %v53_v38 = vadd.f32 %v51_v20, %v44_v28  ;;  %v121_v40 = vld [vmem:[%s255_s1 + $0x80] sm:$0xff]  ;;  %v26_v41 = vadd.f32 %v24_v31, %v18_v24  ;;  %v52_v49 = vmul.f32 %v110_v37, %v108_v36  ;;  %v116_v50 = vld [vmem:[%s255_s1 + $0x68] sm:$0xff]  ;;  %v118_v56 = vld [vmem:[%s255_s1 + $0x78] sm:$0xff] }
   0xc   :  { %v114_v45 = vld [vmem:[%s254_s0 + $0x39] sm:$0xff]  ;;  %v87_v53 = vmul.f32 %v123_v43, %v121_v40  ;;  %v120_v57 = vld [vmem:[%s254_s0 + $0x22] sm:$0xff]  ;;  %v70_v60 = vmul.f32 %v116_v50, %v68_v51 }
   0xd   :  { %v62_v46 = vadd.f32 %v60_v29, %v53_v38  ;;  %v36_v48 = vadd.f32 %v34_v32, %v26_v41  ;;  %v61_v55 = vmul.f32 %v114_v45, %v112_v44  ;;  %v122_v61 = vld [vmem:[%s255_s1 + $0x88] sm:$0xff]  ;;  %v124_v62 = vld [vmem:[%s254_s0 + $0x3a] sm:$0xff]  ;;  %v79_v1 = vmul.f32 %v120_v57, %v118_v56 }
   0xe   :  { %v88_v3 = vmul.f32 %v124_v62, %v122_v61 }
   0xf   :  { %v71_v52 = vadd.f32 %v69_v39, %v62_v46  ;;  %v45_v54 = vadd.f32 %v43_v42, %v36_v48 }
  0x11   :  { %v80_v58 = vadd.f32 %v78_v47, %v71_v52  ;;  %v54_v59 = vadd.f32 %v52_v49, %v45_v54 }
  0x13   :  { %v89_v63 = vadd.f32 %v87_v53, %v80_v58  ;;  %v63_v0 = vadd.f32 %v61_v55, %v54_v59 }
  0x15   :  { %91 = vst [vmem:[%s256_s2] sm:$0xff] %v89_v63  ;;  %v72_v2 = vadd.f32 %v70_v60, %v63_v0 }
  0x17   :  { %v81_v4 = vadd.f32 %v79_v1, %v72_v2 }
  0x19   :  { %v90_v5 = vadd.f32 %v88_v3, %v81_v4 }
  0x1b   :  { %92 = vst [vmem:[%s256_s2 + $0x8] sm:$0xff] %v90_v5 }

</bundles_post_ra>
